<compile_context>
chip_gen: v7x
topology: tpu7x:2x2x1
jax: 0.10.0
libtpu: 0.0.40
codegen_flags: <defaults>
</compile_context>

<pallas_src>
import jax
import jax.numpy as jnp
from jax.experimental import pallas as pl
from jax.experimental.pallas import tpu as pltpu

NUM_CLASSES = 26
N_PAD = 128        # class axis padded to one full lane group
TM_TARGET = 128    # max batch tile (MXU M)
TK_TARGET = 2048   # max reduction (D_in) tile; ~1 MiB/buffer at bf16, fits all gens


def _round_up(x, m):
    return (x + m - 1) // m * m


def _choose_tk(d_pad):
    """Largest K tile <= TK_TARGET that divides d_pad (d_pad is a multiple of
    128).  If the whole reduction fits, collapse it to one grid step."""
    if d_pad <= TK_TARGET:
        return d_pad
    best = 128
    t = 256
    while t <= TK_TARGET:
        if d_pad % t == 0:
            best = t
        t += 128
    return best


def _choose_tm(b_pad):
    """Batch tile: multiple of 16 (bf16 sublane packing), <= TM_TARGET, with at
    most 15 rows of padding waste.  Returns (tm, padded batch)."""
    n_tiles = -(-b_pad // TM_TARGET)
    tm = _round_up(-(-b_pad // n_tiles), 16)
    return tm, n_tiles * tm


def sign_classifier_kernel(x_ref, w_ref, b_ref, out_ref):
    """One (tm, N_PAD) logits tile, reduced over the D_in grid axis.

    x_ref  : (tm, tk)     bf16 flattened-image tile
    w_ref  : (tk, N_PAD)  bf16 combined (encoder @ fc^T) weight tile
    b_ref  : (1, N_PAD)   f32 fc bias (zero-padded)
    out_ref: (tm, N_PAD)  f32 logits tile (doubles as the K accumulator:
             its block index is constant along K, so it stays resident).
    """
    k = pl.program_id(1)

    @pl.when(k == 0)
    def _():
        out_ref[...] = jnp.broadcast_to(b_ref[...], out_ref.shape)

    out_ref[...] += jnp.dot(
        x_ref[...], w_ref[...], preferred_element_type=jnp.float32
    )


def make_sign_classifier(w_enc, w_fc, b_fc):
    """Hoisted (one-time) weight prep; returns a jitted forward(x) -> logits.

    w_enc: (D_in, E) frozen encoder stand-in.  w_fc: (C, E).  b_fc: (C,).
    TODO(synk): folding encoder @ fc^T is only valid while the CLIP encoder
    stand-in is a single linear map; a real ViT/ResNet tower cannot collapse.
    """
    d_in = w_enc.shape[0]
    num_classes = w_fc.shape[0]

    d_pad = _round_up(d_in, 128)
    tk = _choose_tk(d_pad)

    # Fold the two frozen linear layers: logits = x @ (w_enc @ w_fc.T) + b.
    w_comb = w_enc.astype(jnp.float32) @ w_fc.astype(jnp.float32).T  # (D_in, C)
    w_p = jnp.zeros((d_pad, N_PAD), jnp.bfloat16).at[:d_in, :num_classes].set(
        w_comb.astype(jnp.bfloat16))
    b_p = jnp.zeros((1, N_PAD), jnp.float32).at[0, :num_classes].set(
        b_fc.astype(jnp.float32))
    w_p = jax.device_put(w_p)
    b_p = jax.device_put(b_p)

    @jax.jit
    def forward(x_nchw):
        B = x_nchw.shape[0]
        assert x_nchw.shape[1] * x_nchw.shape[2] * x_nchw.shape[3] == d_in

        tm, b_pad = _choose_tm(_round_up(B, 16))

        # Single fused cast + pad of the activations (no f32 round trip).
        x_p = jnp.pad(
            x_nchw.reshape(B, d_in).astype(jnp.bfloat16),
            ((0, b_pad - B), (0, d_pad - d_in)),
        )

        grid = (b_pad // tm, d_pad // tk)   # K axis last (reduction)

        out_p = pl.pallas_call(
            sign_classifier_kernel,
            out_shape=jax.ShapeDtypeStruct((b_pad, N_PAD), jnp.float32),
            grid_spec=pltpu.PrefetchScalarGridSpec(
                num_scalar_prefetch=0,
                grid=grid,
                in_specs=[
                    pl.BlockSpec((tm, tk), lambda i, k: (i, k)),
                    pl.BlockSpec((tk, N_PAD), lambda i, k: (k, 0)),
                    pl.BlockSpec((1, N_PAD), lambda i, k: (0, 0)),
                ],
                out_specs=pl.BlockSpec((tm, N_PAD), lambda i, k: (i, 0)),
            ),
            compiler_params=pltpu.CompilerParams(
                # Batch tiles independent (megacore-shardable on v7x when
                # b_pad/tm >= 2); the D_in reduction axis is "arbitrary".
                dimension_semantics=("parallel", "arbitrary"),
            ),
        )(x_p, w_p, b_p)

        return out_p[:B, :num_classes]

    return forward


def _reference(x_nchw, w_enc, w_fc, b_fc):
    B = x_nchw.shape[0]
    feat = x_nchw.reshape(B, -1).astype(jnp.float32) @ w_enc.astype(jnp.float32)
    return feat @ w_fc.astype(jnp.float32).T + b_fc.astype(jnp.float32)


if __name__ == "__main__":
    # Small shapes consistent with the forward: batch=2, 3-channel 16x16 image,
    # stand-in CLIP output_dim (embed_dim) = 32, num_classes = 26.
    B, C, H, W = 2, 3, 16, 16
    EMBED_DIM = 32

    key = jax.random.PRNGKey(0)
    k_x, k_enc, k_wfc, k_bfc = jax.random.split(key, 4)

    x = jax.random.normal(k_x, (B, C, H, W), dtype=jnp.float32)
    # Frozen encoder stand-in weights (deterministic).
    w_enc = jax.random.normal(k_enc, (C * H * W, EMBED_DIM), dtype=jnp.float32) * 0.02
    # nn.Linear(embed_dim, num_classes): weight (C, E), bias (C,)
    w_fc = jax.random.normal(k_wfc, (NUM_CLASSES, EMBED_DIM), dtype=jnp.float32) * 0.05
    b_fc = jax.random.normal(k_bfc, (NUM_CLASSES,), dtype=jnp.float32) * 0.01

    forward = make_sign_classifier(w_enc, w_fc, b_fc)   # one-time weight prep
    logits = jax.block_until_ready(forward(x))

    ref = _reference(x, w_enc, w_fc, b_fc)
    assert logits.shape == (B, NUM_CLASSES)
    # bf16 operands + folded frozen weights -> small drift vs the f32
    # two-matmul reference; tolerance loosened accordingly.
    assert jnp.allclose(logits, ref, atol=2e-2, rtol=2e-2)

    print("KERNEL_OK")
</pallas_src>

<mosaic_0001>
module attributes {stable_mosaic.version = 11 : i64} {
  func.func @sign_classifier_kernel(%arg0: i32, %arg1: i32, %arg2: memref<16x768xbf16, #tpu.memory_space<vmem>>, %arg3: memref<768x128xbf16, #tpu.memory_space<vmem>>, %arg4: memref<1x128xf32, #tpu.memory_space<vmem>>, %arg5: memref<16x128xf32, #tpu.memory_space<vmem>>) attributes {dimension_semantics = [#tpu.dimension_semantics<parallel>, #tpu.dimension_semantics<arbitrary>], iteration_bounds = array<i64: 1, 1>, scalar_prefetch = 0 : i64, scratch_operands = 0 : i64, tpu.core_type = #tpu.core_type<tc>, window_params = [{transform_indices = @transform_0, window_bounds = array<i64: 16, 768>}, {transform_indices = @transform_1, window_bounds = array<i64: 768, 128>}, {pipeline_mode = #tpu.pipeline_mode<synchronous>, transform_indices = @transform_2, window_bounds = array<i64: 1, 128>}, {transform_indices = @transform_3, window_bounds = array<i64: 16, 128>}]} {
    %c0_i32 = arith.constant 0 : i32
    %0 = arith.cmpi eq, %arg1, %c0_i32 : i32
    %1 = arith.extui %0 : i1 to i32
    %c0_i32_0 = arith.constant 0 : i32
    %2 = arith.cmpi ne, %1, %c0_i32_0 : i32
    scf.if %2 {
      %c0_8 = arith.constant 0 : index
      %c0_9 = arith.constant 0 : index
      %9 = vector.load %arg4[%c0_8, %c0_9] : memref<1x128xf32, #tpu.memory_space<vmem>>, vector<1x128xf32>
      %10 = vector.shape_cast %9 : vector<1x128xf32> to vector<1x128xf32>
      %11 = vector.broadcast %10 : vector<1x128xf32> to vector<16x128xf32>
      %c0_10 = arith.constant 0 : index
      %c0_11 = arith.constant 0 : index
      %12 = vector.load %arg5[%c0_10, %c0_11] : memref<16x128xf32, #tpu.memory_space<vmem>>, vector<16x128xf32>
      tpu.vector_store %arg5[%c0_10, %c0_11], %11 {strides = array<i32>} : memref<16x128xf32, #tpu.memory_space<vmem>>, vector<16x128xf32>,
    } else {
    }
    %c0 = arith.constant 0 : index
    %c0_1 = arith.constant 0 : index
    %3 = vector.load %arg5[%c0, %c0_1] : memref<16x128xf32, #tpu.memory_space<vmem>>, vector<16x128xf32>
    %c0_2 = arith.constant 0 : index
    %c0_3 = arith.constant 0 : index
    %4 = vector.load %arg2[%c0_2, %c0_3] : memref<16x768xbf16, #tpu.memory_space<vmem>>, vector<16x768xbf16>
    %c0_4 = arith.constant 0 : index
    %c0_5 = arith.constant 0 : index
    %5 = vector.load %arg3[%c0_4, %c0_5] : memref<768x128xbf16, #tpu.memory_space<vmem>>, vector<768x128xbf16>
    %cst = arith.constant dense<0.000000e+00> : vector<16x128xf32>
    %6 = tpu.matmul %4, %5, %cst {dimension_numbers = #tpu.dot_dimension_numbers<[1], [0], [0], [1], [0, 0, 1, 1], [], []>} : vector<16x768xbf16>, vector<768x128xbf16>, vector<16x128xf32> -> vector<16x128xf32>
    %7 = arith.addf %3, %6 : vector<16x128xf32>
    %c0_6 = arith.constant 0 : index
    %c0_7 = arith.constant 0 : index
    %8 = vector.load %arg5[%c0_6, %c0_7] : memref<16x128xf32, #tpu.memory_space<vmem>>, vector<16x128xf32>
    tpu.vector_store %arg5[%c0_6, %c0_7], %7 {strides = array<i32>} : memref<16x128xf32, #tpu.memory_space<vmem>>, vector<16x128xf32>,
    return
  }
  func.func @transform_0(%arg0: i32, %arg1: i32) -> (i32, i32) {
    %c0_i32 = arith.constant 0 : i32
    return %arg0, %arg1 : i32, i32
  }
  func.func @transform_1(%arg0: i32, %arg1: i32) -> (i32, i32) {
    %c0_i32 = arith.constant 0 : i32
    %c0_i32_0 = arith.constant 0 : i32
    return %arg1, %c0_i32 : i32, i32
  }
  func.func @transform_2(%arg0: i32, %arg1: i32) -> (i32, i32) {
    %c0_i32 = arith.constant 0 : i32
    %c0_i32_0 = arith.constant 0 : i32
    %c0_i32_1 = arith.constant 0 : i32
    return %c0_i32, %c0_i32_0 : i32, i32
  }
  func.func @transform_3(%arg0: i32, %arg1: i32) -> (i32, i32) {
    %c0_i32 = arith.constant 0 : i32
    %c0_i32_0 = arith.constant 0 : i32
    return %arg0, %c0_i32 : i32, i32
  }
}

</mosaic_0001>

<bundles_post_ra>
// kernel: forward.1
= control target key start
LH: loop header
LB: loop body
LE: loop exit
PB: predicated region body
PF: predicated region fallthrough
CT: control target
= control target key end

     0   :  { %8 = vsyncpa [#allocation3], 0  ;;  %s801_s12 = smov [#allocation2]   ;;  %s863_s0 = inlined_call_operand.vmem [shape: bf16[16,768], index: 0, kind: input, shape index: {}]   ;;  %s864_s1 = inlined_call_operand.hbm [shape: bf16[768,128], index: 1, kind: input, shape index: {}]   ;;  %s865_s2 = inlined_call_operand.vmem [shape: f32[1,128], index: 2, kind: input, shape index: {}]   ;;  %s866_s3 = inlined_call_operand.vmem [shape: f32[16,128], index: 3, kind: output, shape index: {}]  }
   0x1   :  { %s16_s13 = sshll.u32 %s801_s12, 4  ;;  %s777_s16 = scalar_lea.hbm %s864_s1, 6144  ;;  %s17_s13 = int_to_ptr.vmem [resolvable:$true] %s16_s13 }
   0x2   :  { %p778_p0 = scmp.ne.s32.totalorder %s864_s1, %s777_s16  ;;  %p781_p1 = scmp.lt.u32.totalorder %s777_s16, %s864_s1 }
   0x4   :  { %p783_p2 = pnand %p781_p1, %p778_p0 }
   0x6   :  { %786 = shalt.err (!%p783_p2)
}
   0x7   :  { %s787_s21 = scalar_lea.vmem %s17_s13, 6144  ;;  %p792_p4 = scmp.lt.s32.totalorder %s17_s13, %s17_s13 }
   0x8   :  { %p788_p3 = scmp.ne.s32.totalorder %s17_s13, %s787_s21  ;;  %p793_p5 = scmp.lt.s32.totalorder %s787_s21, %s787_s21 }
   0xa   :  { %p794_p6 = por %p793_p5, %p792_p4 }
   0xc   :  { %p795_p7 = pnand %p794_p6, %p788_p3 }
   0xe   :  { %798 = shalt.err (!%p795_p7)
}
   0xf   :  { %s802_s22 = smov 64   ;;  %s803_s23 = smov 4  }
  0x10   :  { %22 = dma.hbm_to_vmem [thread:$0]  %s864_s1, 6144, %s17_s13, [#allocation3], %s802_s22, %s802_s22, %s803_s23  }
  0x11   :  { %799 = dma.done.wait [#allocation3], 6144  }
  0x12   :  { %800 = vsyncadd [#allocation3], 4294961152  ;;  %v720_v0 = vld [vmem:[#allocation2 + $0x40] sm:$0xff]   ;;  %v724_v4 = vld [vmem:[#allocation2 + $0x48] sm:$0xff]  }
  0x13   :  { %v721_v1 = vld [vmem:[#allocation2 + $0xc0] sm:$0xff]   ;;  %651 = vmatprep.subr.bf16.mxu0 %v720_v0  ;;  %v725_v5 = vld [vmem:[#allocation2 + $0xc8] sm:$0xff]   ;;  %v728_v8 = vld [vmem:[#allocation2 + $0x50] sm:$0xff]  }
  0x14   :  { %v722_v2 = vld [vmem:[#allocation2] sm:$0xff]   ;;  %673 = vmatprep.subr.bf16.mxu1 %v721_v1  ;;  %v726_v6 = vld [vmem:[#allocation2 + $0x8] sm:$0xff]   ;;  %v729_v9 = vld [vmem:[#allocation2 + $0xd0] sm:$0xff]  }
  0x15   :  { %v723_v3 = vld [vmem:[#allocation2 + $0x80] sm:$0xff]   ;;  %652 = vmatpush3.bf16.msra.mxu0 %v722_v2  ;;  %v727_v7 = vld [vmem:[#allocation2 + $0x88] sm:$0xff]   ;;  %v730_v10 = vld [vmem:[#allocation2 + $0x10] sm:$0xff]  }
  0x16   :  { %674 = vmatpush3.bf16.msra.mxu1 %v723_v3  ;;  %653 = vmatprep.subr.bf16.mxu0 %v724_v4  ;;  %v731_v11 = vld [vmem:[#allocation2 + $0x90] sm:$0xff]   ;;  %v732_v12 = vld [vmem:[#allocation2 + $0x58] sm:$0xff]   ;;  %v736_v16 = vld [vmem:[#allocation2 + $0x60] sm:$0xff]  }
  0x17   :  { %675 = vmatprep.subr.bf16.mxu1 %v725_v5  ;;  %v733_v13 = vld [vmem:[#allocation2 + $0xd8] sm:$0xff]   ;;  %v737_v17 = vld [vmem:[#allocation2 + $0xe0] sm:$0xff]   ;;  %v740_v20 = vld [vmem:[#allocation2 + $0x68] sm:$0xff]  }
  0x18   :  { %v734_v14 = vld [vmem:[#allocation2 + $0x18] sm:$0xff]   ;;  %v738_v18 = vld [vmem:[#allocation2 + $0x20] sm:$0xff]   ;;  %v741_v21 = vld [vmem:[#allocation2 + $0xe8] sm:$0xff]  }
  0x19   :  { %654 = vmatpush3.bf16.msra.mxu0 %v726_v6  ;;  %v735_v15 = vld [vmem:[#allocation2 + $0x98] sm:$0xff]   ;;  %v739_v19 = vld [vmem:[#allocation2 + $0xa0] sm:$0xff]   ;;  %v742_v22 = vld [vmem:[#allocation2 + $0x28] sm:$0xff]  }
  0x1a   :  { %676 = vmatpush3.bf16.msra.mxu1 %v727_v7  ;;  %655 = vmatprep.subr.bf16.mxu0 %v728_v8  ;;  %v743_v23 = vld [vmem:[#allocation2 + $0xa8] sm:$0xff]   ;;  %v744_v24 = vld [vmem:[#allocation2 + $0x70] sm:$0xff]   ;;  %v748_v28 = vld [vmem:[#allocation2 + $0x78] sm:$0xff]  }
  0x1b   :  { %677 = vmatprep.subr.bf16.mxu1 %v729_v9  ;;  %v745_v25 = vld [vmem:[#allocation2 + $0xf0] sm:$0xff]   ;;  %v749_v29 = vld [vmem:[#allocation2 + $0xf8] sm:$0xff]   ;;  %v755_v34 = vld [vmem:[%s863_s0 + $0x8] ss:$24 sps:$4 sm:$0xff]  }
  0x1c   :  { %v746_v26 = vld [vmem:[#allocation2 + $0x30] sm:$0xff]   ;;  %v750_v30 = vld [vmem:[#allocation2 + $0x38] sm:$0xff]   ;;  %v757_v35 = vld [vmem:[%s863_s0 + $0xc] ss:$24 sps:$4 sm:$0xff]  }
  0x1d   :  { %656 = vmatpush3.bf16.msra.mxu0 %v730_v10  ;;  %v747_v27 = vld [vmem:[#allocation2 + $0xb0] sm:$0xff]   ;;  %v751_v31 = vld [vmem:[#allocation2 + $0xb8] sm:$0xff]   ;;  %v758_v36 = vld [vmem:[#allocation2 + $0x140] sm:$0xff]   ;;  %537 = vmatprep.mubr.bf16.mxu1 %v757_v35 }
  0x1e   :  { %678 = vmatpush3.bf16.msra.mxu1 %v731_v11  ;;  %657 = vmatprep.subr.bf16.mxu0 %v732_v12  ;;  %v752_v32 = vld [vmem:[%s863_s0] ss:$24 sps:$4 sm:$0xff]   ;;  %v754_v33 = vld [vmem:[%s863_s0 + $0x4] ss:$24 sps:$4 sm:$0xff]   ;;  %v760_v38 = vld [vmem:[#allocation2 + $0x148] sm:$0xff]  }
  0x1f   :  { %679 = vmatprep.subr.bf16.mxu1 %v733_v13  ;;  %496 = vmatprep.mubr.bf16.mxu0 %v754_v33  ;;  %v759_v37 = vld [vmem:[#allocation2 + $0x100] sm:$0xff]   ;;  %v761_v39 = vld [vmem:[#allocation2 + $0x108] sm:$0xff]   ;;  %v762_v40 = vld [vmem:[#allocation2 + $0x150] sm:$0xff]  }
  0x20   :  { %v763_v41 = vld [vmem:[#allocation2 + $0x110] sm:$0xff]   ;;  %v764_v42 = vld [vmem:[#allocation2 + $0x158] sm:$0xff]   ;;  %v766_v44 = vld [vmem:[#allocation2 + $0x160] sm:$0xff]  }
  0x21   :  { %658 = vmatpush3.bf16.msra.mxu0 %v734_v14  ;;  %v765_v43 = vld [vmem:[#allocation2 + $0x118] sm:$0xff]   ;;  %v767_v45 = vld [vmem:[#allocation2 + $0x120] sm:$0xff]   ;;  %v768_v46 = vld [vmem:[#allocation2 + $0x168] sm:$0xff]  }
  0x22   :  { %680 = vmatpush3.bf16.msra.mxu1 %v735_v15  ;;  %659 = vmatprep.subr.bf16.mxu0 %v736_v16  ;;  %v776_v47 = vld [vmem:[%s863_s0 + $0x14] ss:$24 sps:$4 sm:$0xff]   ;;  %v772_v51 = vld [vmem:[#allocation2 + $0x178] sm:$0xff]   ;;  %v774_v53 = vld [vmem:[%s863_s0 + $0x10] ss:$24 sps:$4 sm:$0xff]  }
  0x23   :  { %681 = vmatprep.subr.bf16.mxu1 %v737_v17  ;;  %v769_v48 = vld [vmem:[#allocation2 + $0x128] sm:$0xff]   ;;  %v770_v49 = vld [vmem:[#allocation2 + $0x170] sm:$0xff]   ;;  %v773_v52 = vld [vmem:[#allocation2 + $0x138] sm:$0xff]  }
  0x24   :  { %v771_v50 = vld [vmem:[#allocation2 + $0x130] sm:$0xff]   ;;  %v596_v8 = vld [vmem:[%s865_s2] ss:$0 sm:$0xff] }
  0x25   :  { %660 = vmatpush3.bf16.msra.mxu0 %v738_v18 }
  0x26   :  { %682 = vmatpush3.bf16.msra.mxu1 %v739_v19  ;;  %661 = vmatprep.subr.bf16.mxu0 %v740_v20 }
  0x27   :  { %683 = vmatprep.subr.bf16.mxu1 %v741_v21 }
  0x29   :  { %662 = vmatpush3.bf16.msra.mxu0 %v742_v22 }
  0x2a   :  { %684 = vmatpush3.bf16.msra.mxu1 %v743_v23  ;;  %663 = vmatprep.subr.bf16.mxu0 %v744_v24 }
  0x2b   :  { %685 = vmatprep.subr.bf16.mxu1 %v745_v25 }
  0x2d   :  { %664 = vmatpush3.bf16.msra.mxu0 %v746_v26 }
  0x2e   :  { %686 = vmatpush3.bf16.msra.mxu1 %v747_v27  ;;  %665 = vmatprep.subr.bf16.mxu0 %v748_v28 }
  0x2f   :  { %687 = vmatprep.subr.bf16.mxu1 %v749_v29 }
  0x31   :  { %666 = vmatpush3.bf16.msra.mxu0 %v750_v30 }
  0x32   :  { %688 = vmatpush3.bf16.msra.mxu1 %v751_v31  ;;  %695 = vmatprep.subr.bf16.mxu0 %v758_v36 }
  0x34   :  { %497 = vmatmul.mubr.bf16.vlgmr.msra.gmra.mrb[0].mxu0 %v752_v32 }
  0x35   :  { %538 = vmatmul.mubr.bf16.vlgmr.msra.gmra.mrb[0].mxu1 %v755_v34  ;;  %696 = vmatpush3.bf16.msra.mxu0 %v759_v37 }
  0x36   :  { %697 = vmatprep.subr.bf16.mxu0 %v760_v38  ;;  %578 = vmatprep.mubr.bf16.mxu0 %v776_v47 }
  0x39   :  { %698 = vmatpush3.bf16.msra.mxu0 %v761_v39 }
  0x3a   :  { %699 = vmatprep.subr.bf16.mxu0 %v762_v40 }
  0x3d   :  { %700 = vmatpush3.bf16.msra.mxu0 %v763_v41 }
  0x3e   :  { %701 = vmatprep.subr.bf16.mxu0 %v764_v42 }
  0x41   :  { %702 = vmatpush3.bf16.msra.mxu0 %v765_v43 }
  0x42   :  { %703 = vmatprep.subr.bf16.mxu0 %v766_v44 }
  0x45   :  { %704 = vmatpush3.bf16.msra.mxu0 %v767_v45 }
  0x46   :  { %705 = vmatprep.subr.bf16.mxu0 %v768_v46 }
  0x49   :  { %706 = vmatpush3.bf16.msra.mxu0 %v769_v48 }
  0x4a   :  { %707 = vmatprep.subr.bf16.mxu0 %v770_v49 }
  0x4d   :  { %708 = vmatpush3.bf16.msra.mxu0 %v771_v50 }
  0x4e   :  { %709 = vmatprep.subr.bf16.mxu0 %v772_v51 }
  0x51   :  { %710 = vmatpush3.bf16.msra.mxu0 %v773_v52 }
  0x54   :  { %579 = vmatmul.mubr.bf16.vlgmr.msra.gmra.mrb[4].mxu0 %v774_v53 }
 0x107   :  { %v667_v54 = vpop.f32.mrb[0].mxu0 }
 0x108   :  { %v689_v55 = vpop.f32.mrb[0].mxu1  ;;  %v668_v56 = vpop.f32.mrb[1].mxu0 }
 0x109   :  { %v669_v57 = vadd.f32 %v668_v56, %v667_v54  ;;  %v690_v58 = vpop.f32.mrb[1].mxu1  ;;  %v670_v59 = vpop.f32.mrb[2].mxu0 }
 0x10a   :  { %v691_v60 = vadd.f32 %v690_v58, %v689_v55  ;;  %v692_v61 = vpop.f32.mrb[2].mxu1  ;;  %v671_v62 = vpop.f32.mrb[3].mxu0 }
 0x10b   :  { %v672_v63 = vadd.f32 %v671_v62, %v670_v59  ;;  %v693_v0 = vpop.f32.mrb[3].mxu1 }
 0x10c   :  { %v540_v1 = vadd.f32 %v691_v60, %v669_v57  ;;  %v694_v2 = vadd.f32 %v693_v0, %v692_v61 }
 0x10e   :  { %v543_v3 = vadd.f32 %v694_v2, %v672_v63 }
 0x127   :  { %v711_v4 = vpop.f32.mrb[4].mxu0 }
 0x128   :  { %v712_v5 = vpop.f32.mrb[5].mxu0 }
 0x129   :  { %v713_v6 = vadd.f32 %v712_v5, %v711_v4  ;;  %v714_v7 = vpop.f32.mrb[6].mxu0 }
 0x12a   :  { %v715_v9 = vpop.f32.mrb[7].mxu0 }
 0x12b   :  { %v581_v10 = vadd.f32 %v713_v6, %v540_v1  ;;  %v716_v11 = vadd.f32 %v715_v9, %v714_v7 }
 0x12d   :  { %v587_v12 = vadd.f32 %v596_v8, %v581_v10  ;;  %v584_v13 = vadd.f32 %v716_v11, %v543_v3 }
 0x12f   :  { %589 = vst [vmem:[%s866_s3] sm:$0xff] %v587_v12  ;;  %v588_v14 = vadd.f32 %v596_v8, %v584_v13 }
 0x131   :  { %590 = vst [vmem:[%s866_s3 + $0x8] sm:$0xff] %v588_v14 }
 0x132   :  { %595 = vsyncpa [#allocation3], 1 }

</bundles_post_ra>
